<compile_context>
chip_gen: v7x
topology: tpu7x:2x2x1
jax: 0.10.0
libtpu: 0.0.40
codegen_flags: <defaults>
</compile_context>

<pallas_src>
import math

import numpy as np
import jax
import jax.numpy as jnp
from jax.experimental import pallas as pl
from jax.experimental.pallas import tpu as pltpu


# =============================================================================
# Trace-time constants / one-time (model-load-time) parameter preparation
# =============================================================================
def _round_up(x: int, m: int) -> int:
    return (x + m - 1) // m * m


def _freq_phase_table(dim: int) -> jax.Array:
    """(2, dim) f32 table: row0 = [f_0..f_{h-1}, f_0..f_{h-1}], row1 = [0]*h + [pi/2]*h,
    so sin(t*row0 + row1) == concat([sin(t*f), cos(t*f)], -1).  One table -> one DMA."""
    assert dim % 2 == 0 and dim >= 4, "time_emb_dim must be even and >= 4"
    half = dim // 2
    scale = math.log(10000.0) / (half - 1)
    freqs = np.exp(np.arange(half, dtype=np.float64) * (-scale)).astype(np.float32)
    row0 = np.concatenate([freqs, freqs])
    row1 = np.concatenate([np.zeros(half, np.float32),
                           np.full(half, np.pi / 2.0, np.float32)])
    return jnp.asarray(np.stack([row0, row1], axis=0).astype(np.float32))


def prepare_time_mlp_params(w: jax.Array, b: jax.Array, mxu_dtype=jnp.bfloat16):
    """One-time transform of CoarseBlock.time_mlp Linear params (call at checkpoint load,
    NOT per forward):
      * pad mid_ch up to a multiple of 128 -> lane-dense (unmasked) output stores;
      * cast the weight to bf16 once (halves HBM/VMEM weight traffic; MXU-native on
        v6e/v7x, still fine on v5e).  Bias stays f32 (added after the f32 accumulate)."""
    dim, mid = w.shape
    mid_pad = max(128, _round_up(mid, 128))
    w_pad = jnp.pad(w.astype(jnp.float32), ((0, 0), (0, mid_pad - mid))).astype(mxu_dtype)
    b_pad = jnp.pad(b.astype(jnp.float32), (0, mid_pad - mid)).reshape(1, mid_pad)
    return w_pad, b_pad


def _nearest_expansion_matrix(H, W, LH, LW) -> jax.Array:
    """(H*W, LH*LW) f32 one-hot matrix M with M[p, q] = 1 iff source pixel p is the
    nearest-neighbor source of output pixel q (PyTorch floor convention
    src = floor(dst * in / out)), so x_flat @ M == flattened nearest-upsampled x."""
    oi = np.arange(LH)[:, None]
    oj = np.arange(LW)[None, :]
    si = (oi * H) // LH
    sj = (oj * W) // LW
    src = (si * W + sj).reshape(-1)                                    # (LH*LW,)
    M = (np.arange(H * W)[:, None] == src[None, :]).astype(np.float32)  # (P, Q)
    return jnp.asarray(M)


# =============================================================================
# Kernels
# =============================================================================
def _time_mlp_kernel(t_ref, tab_ref, w_ref, b_ref, out_ref):
    """Fused: sinusoidal timestep embedding -> Linear(time_emb_dim, mid_pad) -> ReLU.
    t_ref (B,1) f32; tab_ref (2,dim) f32; w_ref (dim,mid_pad) bf16; b_ref (1,mid_pad) f32;
    out_ref (B, mid_pad) f32 (lane-dense)."""
    freqs = tab_ref[0:1, :]
    phase = tab_ref[1:2, :]
    emb = jnp.sin(t_ref[...] * freqs + phase)                 # (B, dim) f32 — single EUP pass
    h = jnp.dot(emb.astype(w_ref.dtype), w_ref[...],          # bf16 into the MXU
                preferred_element_type=jnp.float32)           # f32 accumulate
    out_ref[...] = jnp.maximum(h + b_ref[...], 0.0)           # f32 bias + ReLU


def _upsample_concat_kernel(x_ref, lvl_ref, m_ref, out_ref):
    """One batch item per grid step (fused F.interpolate(nearest) + torch.cat, dim=1):
         out[0, :C , :] = x_flat @ M   (nearest upsample on the MXU, lane-dense Q axis)
         out[0, C: , :] = lvl          (straight copy; never round-trips x_up via HBM)."""
    C = x_ref.shape[1]
    up = jnp.dot(x_ref[0], m_ref[...], preferred_element_type=jnp.float32)  # (C, Q)
    out_ref[0, :C, :] = up.astype(out_ref.dtype)
    out_ref[0, C:, :] = lvl_ref[0]


# =============================================================================
# Wrappers
# =============================================================================
def sinusoidal_position_embeddings(time: jax.Array, dim: int) -> jax.Array:
    """Plain-XLA sinusoidal timestep embedding (reference / standalone use only).
    Deliberately NOT a Pallas call: a custom-call launch costs more than this op."""
    half = dim // 2
    scale = math.log(10000.0) / (half - 1)
    freqs = jnp.exp(jnp.arange(half, dtype=jnp.float32) * (-scale))
    args = time.astype(jnp.float32)[:, None] * freqs[None, :]
    return jnp.concatenate([jnp.sin(args), jnp.cos(args)], axis=-1)


def time_mlp(time: jax.Array, w_pad: jax.Array, b_pad: jax.Array, mid_ch: int) -> jax.Array:
    """CoarseBlock.time_mlp with the sinusoidal embedding fused in.
    time (B,); w_pad/b_pad from prepare_time_mlp_params.  Returns (B, mid_ch, 1, 1)."""
    B = time.shape[0]
    dim, mid_pad = w_pad.shape
    tab = _freq_phase_table(dim)
    t2d = time.astype(jnp.float32).reshape(B, 1)
    # grid=() on purpose: at B~8 a grid would only add per-step overhead (see review);
    # add a batch-parallel grid only once B reaches the hundreds.
    out = pl.pallas_call(
        _time_mlp_kernel,
        out_shape=jax.ShapeDtypeStruct((B, mid_pad), jnp.float32),
        in_specs=[
            pl.BlockSpec((B, 1), lambda: (0, 0), memory_space=pltpu.VMEM),
            pl.BlockSpec((2, dim), lambda: (0, 0), memory_space=pltpu.VMEM),
            pl.BlockSpec((dim, mid_pad), lambda: (0, 0), memory_space=pltpu.VMEM),
            pl.BlockSpec((1, mid_pad), lambda: (0, 0), memory_space=pltpu.VMEM),
        ],
        out_specs=pl.BlockSpec((B, mid_pad), lambda: (0, 0), memory_space=pltpu.VMEM),
    )(t2d, tab, w_pad, b_pad)
    # TODO(synk): in the full CoarseBlock this slice/reshape disappears — the per-channel
    # broadcast-add of t_emb would be fused into the head/tail consumer kernel instead.
    return out[:, :mid_ch].reshape(B, mid_ch, 1, 1)


def upsample_concat(x: jax.Array, lvl: jax.Array) -> jax.Array:
    """Fused torch: cat([F.interpolate(x, lvl.shape[-2:], mode='nearest'), lvl], dim=1).
    Spatial dims are flattened so the lane axis is LH*LW (>=128), not LW."""
    B, C, H, W = x.shape
    Bl, Cl, LH, LW = lvl.shape
    assert B == Bl and C == Cl, "x and lvl must share batch and channel counts"
    P, Q = H * W, LH * LW
    M = _nearest_expansion_matrix(H, W, LH, LW)   # trace-time constant
    x_f = x.reshape(B, C, P)                      # contiguous reshapes: free metadata ops
    lvl_f = lvl.reshape(B, C, Q)
    out = pl.pallas_call(
        _upsample_concat_kernel,
        out_shape=jax.ShapeDtypeStruct((B, 2 * C, Q), x.dtype),
        grid=(B,),
        in_specs=[
            pl.BlockSpec((1, C, P), lambda b: (b, 0, 0)),
            pl.BlockSpec((1, C, Q), lambda b: (b, 0, 0)),
            pl.BlockSpec((P, Q), lambda b: (0, 0)),   # same block every step -> stays resident
        ],
        out_specs=pl.BlockSpec((1, 2 * C, Q), lambda b: (b, 0, 0)),
        compiler_params=pltpu.CompilerParams(dimension_semantics=("parallel",)),
    )(x_f, lvl_f, M)
    # TODO(synk): for production feature-map sizes replace the one-hot expansion matmul
    # with a separable / DMA-based upsample (it is O(P*Q)), and size tiles for v7x's 64 MiB VMEM.
    return out.reshape(B, 2 * C, LH, LW)


def coarse_block_forward(x, lvl, time, w_pad, b_pad, mid_ch):
    """CoarseBlock.forward restricted to the ops whose definitions appear in the spec."""
    y_head_in = upsample_concat(x, lvl)            # fused F.interpolate(nearest) + torch.cat
    t_emb = time_mlp(time, w_pad, b_pad, mid_ch)   # fused embedding + Linear + ReLU + Unflatten
    # TODO(synk): self.head / self.attn / self.tail / self.noise use Residual, LinearAttention
    # and toOut which are not defined in the provided source, so
    # y = tail(attn(head(y_head_in)) + t_emb) and noise = toOut(y) + lvl[:, :3] are not built here.
    return y_head_in, t_emb


# =============================================================================
# Self-test
# =============================================================================
if __name__ == "__main__":
    key = jax.random.PRNGKey(0)
    B = 8
    IN_CH, MID_CH = 4, 32
    TIME_DIM = 32
    H = W = 8            # x spatial
    LH = LW = 16         # lvl spatial (F.interpolate target)

    k1, k2, k3, k4, k5 = jax.random.split(key, 5)
    time = jax.random.randint(k1, (B,), 0, 1000).astype(jnp.float32)
    x = jax.random.normal(k2, (B, IN_CH, H, W), jnp.float32)
    lvl = jax.random.normal(k3, (B, IN_CH, LH, LW), jnp.float32)
    time_w = jax.random.normal(k4, (TIME_DIM, MID_CH), jnp.float32) / math.sqrt(TIME_DIM)
    time_b = jax.random.normal(k5, (MID_CH,), jnp.float32) * 0.1

    # One-time parameter preparation (pad mid_ch to 128 lanes, cast weight to bf16).
    w_pad, b_pad = prepare_time_mlp_params(time_w, time_b)

    # 1) Fused embedding + CoarseBlock.time_mlp (Linear -> ReLU -> Unflatten).
    t_emb = jax.block_until_ready(time_mlp(time, w_pad, b_pad, MID_CH))
    emb_ref = sinusoidal_position_embeddings(time, TIME_DIM)
    t_ref = jax.nn.relu(emb_ref @ time_w + time_b).reshape(B, MID_CH, 1, 1)
    assert t_emb.shape == (B, MID_CH, 1, 1) and t_emb.dtype == jnp.float32
    # Tolerance covers Mosaic-vs-XLA sin at timestep-scale args plus the intentional
    # bf16 MXU feed (accumulation stays f32).
    mlp_err = float(jnp.max(jnp.abs(t_emb - t_ref)))
    assert mlp_err < 1e-1, f"time_mlp mismatch vs reference, max abs err {mlp_err}"

    # 2) Fused nearest upsample + channel concat.
    y = jax.block_until_ready(upsample_concat(x, lvl))
    si = (np.arange(LH) * H) // LH
    sj = (np.arange(LW) * W) // LW
    x_up_ref = x[:, :, si][:, :, :, sj]            # PyTorch 'nearest' floor convention
    assert y.shape == (B, 2 * IN_CH, LH, LW) and y.dtype == jnp.float32
    # one-hot MXU expansion: exact up to the f32-matmul pass configuration (<= bf16 rounding)
    up_err = float(jnp.max(jnp.abs(y[:, :IN_CH] - x_up_ref)))
    assert up_err < 2e-2, f"upsample mismatch vs reference, max abs err {up_err}"
    assert bool(jnp.all(y[:, IN_CH:] == lvl)), "lvl half of the concat must be bit-exact"

    # 3) CoarseBlock.forward glue (fused upsample+concat and the time path).
    y_head_in, t_emb2 = coarse_block_forward(x, lvl, time, w_pad, b_pad, MID_CH)
    y_head_in = jax.block_until_ready(y_head_in)
    assert y_head_in.shape == (B, 2 * IN_CH, LH, LW)
    assert t_emb2.shape == (B, MID_CH, 1, 1)

    print("KERNEL_OK")
</pallas_src>

<mosaic_0001>
module attributes {stable_mosaic.version = 11 : i64} {
  func.func @_time_mlp_kernel(%arg0: memref<8x1xf32, #tpu.memory_space<vmem>>, %arg1: memref<2x32xf32, #tpu.memory_space<vmem>>, %arg2: memref<32x128xbf16, #tpu.memory_space<vmem>>, %arg3: memref<1x128xf32, #tpu.memory_space<vmem>>, %arg4: memref<8x128xf32, #tpu.memory_space<vmem>>) attributes {dimension_semantics = [], scalar_prefetch = 0 : i64, scratch_operands = 0 : i64, tpu.core_type = #tpu.core_type<tc>} {
    %c0 = arith.constant 0 : index
    %c0_0 = arith.constant 0 : index
    %0 = vector.load %arg1[%c0, %c0_0] : memref<2x32xf32, #tpu.memory_space<vmem>>, vector<1x32xf32>
    %c1 = arith.constant 1 : index
    %c0_1 = arith.constant 0 : index
    %1 = vector.load %arg1[%c1, %c0_1] : memref<2x32xf32, #tpu.memory_space<vmem>>, vector<1x32xf32>
    %c0_2 = arith.constant 0 : index
    %c0_3 = arith.constant 0 : index
    %2 = vector.load %arg0[%c0_2, %c0_3] : memref<8x1xf32, #tpu.memory_space<vmem>>, vector<8x1xf32>
    %3 = vector.broadcast %2 : vector<8x1xf32> to vector<8x32xf32>
    %4 = vector.broadcast %0 : vector<1x32xf32> to vector<8x32xf32>
    %5 = arith.mulf %3, %4 : vector<8x32xf32>
    %6 = vector.broadcast %1 : vector<1x32xf32> to vector<8x32xf32>
    %7 = arith.addf %5, %6 : vector<8x32xf32>
    %8 = math.sin %7 : vector<8x32xf32>
    %9 = arith.truncf %8 : vector<8x32xf32> to vector<8x32xbf16>
    %c0_4 = arith.constant 0 : index
    %c0_5 = arith.constant 0 : index
    %10 = vector.load %arg2[%c0_4, %c0_5] : memref<32x128xbf16, #tpu.memory_space<vmem>>, vector<32x128xbf16>
    %cst = arith.constant dense<0.000000e+00> : vector<8x128xf32>
    %11 = tpu.matmul %9, %10, %cst {dimension_numbers = #tpu.dot_dimension_numbers<[1], [0], [0], [1], [0, 0, 1, 1], [], []>} : vector<8x32xbf16>, vector<32x128xbf16>, vector<8x128xf32> -> vector<8x128xf32>
    %c0_6 = arith.constant 0 : index
    %c0_7 = arith.constant 0 : index
    %12 = vector.load %arg3[%c0_6, %c0_7] : memref<1x128xf32, #tpu.memory_space<vmem>>, vector<1x128xf32>
    %13 = vector.broadcast %12 : vector<1x128xf32> to vector<8x128xf32>
    %14 = arith.addf %11, %13 : vector<8x128xf32>
    %cst_8 = arith.constant 0.000000e+00 : f32
    %15 = vector.broadcast %cst_8 : f32 to vector<8x128xf32>
    %16 = arith.maximumf %14, %15 : vector<8x128xf32>
    %c0_9 = arith.constant 0 : index
    %c0_10 = arith.constant 0 : index
    %17 = vector.load %arg4[%c0_9, %c0_10] : memref<8x128xf32, #tpu.memory_space<vmem>>, vector<8x128xf32>
    tpu.vector_store %arg4[%c0_9, %c0_10], %16 {strides = array<i32>} : memref<8x128xf32, #tpu.memory_space<vmem>>, vector<8x128xf32>,
    return
  }
}

</mosaic_0001>

<bundles_post_ra>
// kernel: tpu_custom_call.1
= control target key start
LH: loop header
LB: loop body
LE: loop exit
PB: predicated region body
PF: predicated region fallthrough
CT: control target
= control target key end

     0   :  { %9 = vsyncpa [#allocation3], 0  ;;  %s422_s0 = inlined_call_operand.vmem [shape: f32[8,1], index: 0, kind: input, shape index: {}]   ;;  %s423_s1 = inlined_call_operand.hbm [shape: f32[2,32], index: 1, kind: input, shape index: {}]   ;;  %s424_s2 = inlined_call_operand.vmem [shape: bf16[32,128], index: 2, kind: input, shape index: {}]   ;;  %s425_s3 = inlined_call_operand.vmem [shape: f32[1,128], index: 3, kind: input, shape index: {}]   ;;  %s426_s4 = inlined_call_operand.hbm [shape: f32[8,128], index: 4, kind: output, shape index: {}]  }
   0x1   :  { %10 = vsyncpa [#allocation4], 0  ;;  %s329_s15 = smov [#allocation2]   ;;  %s281_s19 = scalar_lea.hbm %s423_s1, 32 }
   0x2   :  { %s19_s16 = sshll.u32 %s329_s15, 4  ;;  %p282_p0 = scmp.ne.s32.totalorder %s423_s1, %s281_s19  ;;  %s20_s16 = int_to_ptr.vmem [resolvable:$true] %s19_s16 }
   0x3   :  { %p285_p1 = scmp.lt.u32.totalorder %s281_s19, %s423_s1 }
   0x5   :  { %p287_p2 = pnand %p285_p1, %p282_p0 }
   0x7   :  { %290 = shalt.err (!%p287_p2)
}
   0x8   :  { %s291_s24 = scalar_lea.vmem %s20_s16, 32  ;;  %p296_p4 = scmp.lt.s32.totalorder %s20_s16, %s20_s16 }
   0x9   :  { %p292_p3 = scmp.ne.s32.totalorder %s20_s16, %s291_s24  ;;  %p297_p5 = scmp.lt.s32.totalorder %s291_s24, %s291_s24 }
   0xb   :  { %p298_p6 = por %p297_p5, %p296_p4 }
   0xd   :  { %p299_p7 = pnand %p298_p6, %p292_p3 }
   0xf   :  { %302 = shalt.err (!%p299_p7)
}
  0x10   :  { %22 = dma.hbm_to_vmem [thread:$0]  %s423_s1, 32, %s20_s16, [#allocation3]  }
  0x11   :  { %325 = dma.done.wait [#allocation3], 32  }
  0x12   :  { %326 = vsyncadd [#allocation3], 4294967264  ;;  %v330_v0 = vmov 0   ;;  %v33_v1 = vld [vmem:[%s422_s0] sm:$0xff]  ;;  %v331_v3 = vmov 0.0   ;;  %vm332_vm0 = vmmov 0  }
  0x13   :  { %274 = vset.pattern.permute.xlu0 %v330_v0  ;;  %v275_v2 = vld [vmem:[%s424_s2] sm:$0xff]   ;;  %251 = vmatprep.subr.bf16.mxu0 %v331_v3  ;;  %v276_v4 = vld [vmem:[%s424_s2 + $0x8] sm:$0xff]   ;;  %v238_v5 = vld [vmem:[#allocation2] ss:$0 sm:$0xff]  ;;  %v333_v20 = vmov 683565275  }
  0x14   :  { %36 = vperm.xlu0 %274, %v33_v1   ;;  %255 = vmatprep.mubr.msk.bf16.mxu0 %vm332_vm0, %v331_v3  ;;  %v239_v7 = vld [vmem:[#allocation2 + $0x1] ss:$0 sm:$0xff]  ;;  %v334_v22 = vmov 2475754826   ;;  %v335_v25 = vmov 2131351028  }
  0x15   :  { %252 = vmatpush3.bf16.msra.mxu0 %v275_v2  ;;  %v336_v28 = vmov 2102212464   ;;  %v337_v31 = vmov 920167782   ;;  %v338_v34 = vmov 1326507024  }
  0x16   :  { %253 = vmatprep.subr.bf16.mxu0 %v331_v3  ;;  %vm177_vm14 = vcmask 261120   ;;  %s339_s6 = smov [#allocation5]  }
  0x17   :  { %s229_s7 = sshll.u32 %s339_s6, 4  ;;  %s230_s7 = int_to_ptr.vmem [resolvable:$true] %s229_s7 }
  0x18   :  { %s303_s8 = scalar_lea.vmem %s230_s7, 128  ;;  %p308_p9 = scmp.lt.s32.totalorder %s230_s7, %s230_s7 }
  0x19   :  { %254 = vmatpush3.bf16.msra.mxu0 %v276_v4  ;;  %p304_p8 = scmp.ne.s32.totalorder %s230_s7, %s303_s8  ;;  %p309_p10 = scmp.lt.s32.totalorder %s303_s8, %s303_s8 }
  0x1b   :  { %p310_p11 = por %p309_p10, %p308_p9 }
  0x1d   :  { %p311_p12 = pnand %p310_p11, %p304_p8 }
  0x93   :  { %v37_v6 = vpop.permute.xlu0 %36 }
  0x94   :  { %v43_v8 = vmul.f32 %v238_v5, %v37_v6 }
  0x96   :  { %v386_v9 = vadd.f32 %v239_v7, %v43_v8 }
  0x98   :  { %v52_v10 = vand.u32 2139095040, %v386_v9  ;;  %v49_v14 = vand.u32 2147483647, %v386_v9  ;;  %vm51_vm8 = vcmp.lt.s32.totalorder %v386_v9, 0  ;;  %vm141_vm13 = vweird.f32 %v386_v9 }
  0x9a   :  { %v53_v11 = vshrl.u32 %v52_v10, 23  ;;  %v56_v17 = vand.u32 8388607, %v49_v14  ;;  %vm50_vm9 = vcmp.le.f32.partialorder %v49_v14, 0.7853982 }
  0x9c   :  { %v240_v12 = vadd.s32 4294967169, %v53_v11  ;;  %v57_v36 = vor.u32 8388608, %v56_v17 }
  0x9e   :  { %v59_v13 = vadd.s32 1, %v240_v12  ;;  %v97_v50 = vshll.u32 %v57_v36, 8 }
  0xa0   :  { %vm60_vm1 = vcmp.gt.s32.totalorder %v59_v13, 0 }
  0xa1   :  { %v61_v15 = vsel %vm60_vm1, %v59_v13, 0 }
  0xa2   :  { %v63_v16 = vand.u32 31, %v61_v15  ;;  %v62_v19 = vshrl.u32 %v61_v15, 5 }
  0xa4   :  { %v64_v18 = vsub.s32 32, %v63_v16  ;;  %v66_v21 = vshll.u32 %v333_v20, %v63_v16  ;;  %v69_v23 = vshll.u32 %v334_v22, %v63_v16  ;;  %v72_v27 = vshll.u32 %v335_v25, %v63_v16 }
  0xa5   :  { %v75_v30 = vshll.u32 %v336_v28, %v63_v16  ;;  %v78_v33 = vshll.u32 %v337_v31, %v63_v16  ;;  %vm81_vm2 = vcmp.lt.s32.totalorder %v62_v19, 1  ;;  %vm84_vm3 = vcmp.lt.s32.totalorder %v62_v19, 4 }
  0xa6   :  { %v67_v24 = vshrl.u32 %v334_v22, %v64_v18  ;;  %v70_v26 = vshrl.u32 %v335_v25, %v64_v18  ;;  %v73_v29 = vshrl.u32 %v336_v28, %v64_v18  ;;  %v76_v32 = vshrl.u32 %v337_v31, %v64_v18 }
  0xa7   :  { %v79_v35 = vshrl.u32 %v338_v34, %v64_v18  ;;  %v65_v45 = vshrl.u32 %v333_v20, %v64_v18  ;;  %vm83_vm4 = vcmp.lt.s32.totalorder %v62_v19, 3  ;;  %vm82_vm5 = vcmp.lt.s32.totalorder %v62_v19, 2 }
  0xa8   :  { %v68_v37 = vor.u32 %v67_v24, %v66_v21  ;;  %v71_v38 = vor.u32 %v70_v26, %v69_v23  ;;  %v74_v39 = vor.u32 %v73_v29, %v72_v27  ;;  %v77_v40 = vor.u32 %v76_v32, %v75_v30 }
  0xa9   :  { %v80_v41 = vor.u32 %v79_v35, %v78_v33 }
  0xaa   :  { %v86_v42 = vsel %vm84_vm3, %v74_v39, 2102212464  ;;  %v89_v43 = vsel %vm81_vm2, %v68_v37, %v71_v38  ;;  %v93_v44 = vsel %vm81_vm2, %v71_v38, %v74_v39  ;;  %v90_v46 = vsel %vm84_vm3, %v77_v40, 920167782 }
  0xab   :  { %v94_v47 = vsel %vm84_vm3, %v80_v41, 1326507024  ;;  %v91_v48 = vsel %vm83_vm4, %v74_v39, %v90_v46  ;;  %v85_v51 = vsel %vm81_vm2, %v65_v45, %v68_v37  ;;  %v87_v52 = vsel %vm83_vm4, %v71_v38, %v86_v42  ;;  %v244_v39 = vld [vmem:[%s425_s3] ss:$0 sm:$0xff] }
  0xac   :  { %v95_v49 = vsel %vm83_vm4, %v77_v40, %v94_v47  ;;  %v92_v53 = vsel %vm82_vm5, %v89_v43, %v91_v48  ;;  %v88_v59 = vsel %vm82_vm5, %v85_v51, %v87_v52 }
  0xad   :  { %v96_v54 = vsel %vm82_vm5, %v93_v44, %v95_v49  ;;  %v395_v57 = vmul.u32.u64.low %v97_v50, %v92_v53  ;;  %v396_v58 = vmul.u32.u64.high %v97_v50, %v92_v53, %v395_v57  ;;  %v104_v61 = vmul.u32 %v97_v50, %v88_v59 }
  0xae   :  { %v392_v55 = vmul.u32.u64.low %v97_v50, %v96_v54  ;;  %v393_v56 = vmul.u32.u64.high %v97_v50, %v96_v54, %v392_v55 }
  0xaf   :  { %v107_v60 = vadd.s32 1, %v396_v58 }
  0xb0   :  { %vm106_vm6 = vc.u32 %v393_v56, %v395_v57  ;;  %v105_v10 = vadd.s32 %v395_v57, %v393_v56 }
  0xb1   :  { %v108_v62 = vsel %vm106_vm6, %v107_v60, %v396_v58 }
  0xb2   :  { %v109_v63 = vadd.s32 %v108_v62, %v104_v61 }
  0xb4   :  { %v110_v0 = vadd.s32 536870912, %v109_v63 }
  0xb6   :  { %v111_v1 = vshrl.u32 %v110_v0, 30 }
  0xb8   :  { %v112_v2 = vshll.u32 %v111_v1, 30  ;;  %v135_v23 = vsub.s32 4, %v111_v1 }
  0xba   :  { %v113_v3 = vsub.s32 %v109_v63, %v112_v2  ;;  %v136_v26 = vsel %vm51_vm8, %v135_v23, %v111_v1 }
  0xbb   :  { %v138_v28 = vsel %vm50_vm9, 0, %v136_v26 }
  0xbc   :  { %v115_v4 = vsub.s32 0, %v113_v3  ;;  %v142_v29 = vadd.s32 3, %v138_v28 }
  0xbe   :  { %v241_v5 = vmin.u32 %v115_v4, %v113_v3  ;;  %v143_v30 = vand.u32 3, %v142_v29 }
  0xc0   :  { %v117_v6 = vclz %v241_v5  ;;  %vm148_vm10 = vcmp.eq.s32.totalorder %v143_v30, 2  ;;  %vm145_vm11 = vcmp.eq.s32.totalorder %v143_v30, 0  ;;  %vm144_vm12 = vcmp.lt.s32.totalorder %v143_v30, 2 }
  0xc2   :  { %v242_v7 = vadd.s32 4294967294, %v117_v6 }
  0xc4   :  { %vm243_vm7 = vcmp.lt.s32.totalorder %v242_v7, 0 }
  0xc5   :  { %v120_v8 = vsel %vm243_vm7, 0, %v242_v7 }
  0xc6   :  { %v121_v11 = vsub.s32 32, %v120_v8  ;;  %v125_v12 = vsub.s32 4294967266, %v120_v8  ;;  %v122_v13 = vshll.u32 %v113_v3, %v120_v8 }
  0xc8   :  { %v123_v15 = vshrl.u32 %v105_v10, %v121_v11  ;;  %v126_v16 = vadd.s32 127, %v125_v12 }
  0xca   :  { %v124_v17 = vor.u32 %v123_v15, %v122_v13  ;;  %v127_v18 = vshll.u32 %v126_v16, 23 }
  0xcc   :  { %v128_v19 = vor.u32 4788187, %v127_v18  ;;  %v131_v21 = vcvt.s32.f32 %v124_v17 }
  0xce   :  { %v129_v20 = vand.u32 2147483647, %v128_v19 }
  0xd0   :  { %v132_v22 = vmul.f32 %v131_v21, %v129_v20 }
  0xd2   :  { %v133_v24 = vxor.u32 2147483648, %v132_v22 }
  0xd4   :  { %v134_v25 = vsel %vm51_vm8, %v133_v24, %v132_v22 }
  0xd5   :  { %v137_v27 = vsel %vm50_vm9, %v386_v9, %v134_v25 }
  0xd6   :  { %277 = vcosq.f32 %v137_v27 }
  0xd7   :  { %279 = vsinq.f32 %v137_v27 }
  0xe0   :  { %v278_v31 = vpop.eup %277 }
  0xe1   :  { %v280_v32 = vpop.eup %279  ;;  %v149_v33 = vxor.u32 2147483648, %v278_v31 }
  0xe2   :  { %v146_v34 = vxor.u32 2147483648, %v280_v32 }
  0xe3   :  { %v150_v35 = vsel %vm148_vm10, %v149_v33, %v280_v32 }
  0xe4   :  { %v147_v36 = vsel %vm145_vm11, %v278_v31, %v146_v34 }
  0xe5   :  { %v151_v14 = vsel %vm144_vm12, %v147_v36, %v150_v35 }
  0xe6   :  { %v152_v37 = vsel %vm141_vm13, nan, %v151_v14 }
  0xe7   :  { %v153_v38 = vpack.c.bf16 %v152_v37, %v152_v37 }
  0xe9   :  { %256 = vmatmul.mubr.msk.bf16.vlgmr.msra.gmra.mrb[0].mxu0 %vm177_vm14, %v153_v38 }
 0x1bc   :  { %v215_v40 = vpop.f32.mrb[0].mxu0 }
 0x1bd   :  { %v216_v41 = vadd.f32 %v244_v39, %v215_v40  ;;  %v257_v42 = vpop.f32.mrb[1].mxu0 }
 0x1be   :  { %v218_v43 = vpop.f32.mrb[2].mxu0 }
 0x1bf   :  { %v221_v44 = vmax.f32 %v216_v41, 0.0  ;;  %v258_v45 = vpop.f32.mrb[3].mxu0 }
 0x1c1   :  { %222 = vst [vmem:[#allocation5] sm:$0xff] %v221_v44 }
 0x1c2   :  { %314 = shalt.err (!%p311_p12)
}
 0x1c3   :  { %s315_s3 = scalar_lea.hbm %s426_s4, 128 }
 0x1c4   :  { %p316_p13 = scmp.ne.s32.totalorder %s426_s4, %s315_s3  ;;  %p319_p0 = scmp.lt.u32.totalorder %s315_s3, %s426_s4 }
 0x1c6   :  { %p321_p1 = pnand %p319_p0, %p316_p13 }
 0x1c8   :  { %324 = shalt.err (!%p321_p1)
}
 0x1c9   :  { %232 = dma.vmem_to_hbm [thread:$0]  %s230_s7, 128, %s426_s4, [#allocation4]  }
 0x1ca   :  { %327 = dma.done.wait [#allocation4], 128  }
 0x1cb   :  { %328 = vsyncadd [#allocation4], 4294967168 }
 0x1cc   :  { %236 = vsyncpa [#allocation3], 1 }
 0x1cd   :  { %237 = vsyncpa [#allocation4], 1 }

</bundles_post_ra>
